<compile_context>
chip_gen: v5e
topology: v5e:2x2
jax: 0.10.0
libtpu: 0.0.40
codegen_flags: <defaults>
</compile_context>

<pallas_src>
import functools

import jax
import jax.numpy as jnp
from jax.experimental import pallas as pl
from jax.experimental.pallas import tpu as pltpu


def _round_up(x, m):
    return (x + m - 1) // m * m


def _loss_kernel(logit_ref, tgt_ref, mulv_ref, aux_ref, out_ref,
                 ce_acc_ref, misc_ref,
                 *, alpha, beta, margin, n_rows, tile_rows, needs_mask):
    i = pl.program_id(0)

    # ---------------- step 0: init + KL + triplet ---------------------------
    # Runs on the first grid step so it overlaps the DMA of the next logits
    # tile (the last step has no next-tile DMA to hide behind).
    @pl.when(i == 0)
    def _init_and_side_losses():
        ce_acc_ref[...] = jnp.zeros_like(ce_acc_ref)

        emb = mulv_ref[0]                                      # (B, D) f32
        lv = mulv_ref[1]                                       # (B, D) f32
        aux = aux_ref[...]                                     # (B, 2) f32
        sgn = aux[:, 0:1]                                      # in {-1, 0, 1}
        third = aux[:, 1:2].astype(jnp.int32)

        bsz = emb.shape[0]
        s1 = jnp.exp(lv)   # anchor variance — shared by KL and both distances

        kl = jnp.mean(jnp.sum(emb * emb + s1 - lv - 1.0,
                              axis=-1, keepdims=True)) * 0.5

        # Tiny permutation matrices: p2 selects row (i+1)%B ("second"), p3
        # selects row third[i] ("third"); exp(lv) of those rows is recovered
        # exactly by permuting s1 (no extra EUP exp passes).
        ri = jax.lax.broadcasted_iota(jnp.int32, (bsz, bsz), 0)
        ci = jax.lax.broadcasted_iota(jnp.int32, (bsz, bsz), 1)
        nxt = jnp.where(ri == bsz - 1, 0, ri + 1)
        p2 = (ci == nxt).astype(jnp.float32)
        p3 = (ci == third).astype(jnp.float32)

        def permute(p, x):
            return jnp.dot(p, x, preferred_element_type=jnp.float32)

        es, lvs, s2s = permute(p2, emb), permute(p2, lv), permute(p2, s1)
        et, lvt, s2t = permute(p3, emb), permute(p3, lv), permute(p3, s1)

        sum_lv1 = jnp.sum(lv, axis=-1, keepdims=True)

        def bhatt(u2, lv2, s2):
            sm = (s1 + s2) * 0.5
            # Approx EUP reciprocal + one Newton step: far cheaper than a
            # full divide, ~1e-6 rel error (keeps the (cons > 0) mask
            # decisions identical to the reference).
            inv = pl.reciprocal(sm, approx=True)
            inv = inv * (2.0 - sm * inv)
            d1 = jnp.sum((emb - u2) ** 2 * inv, axis=-1, keepdims=True) * 0.125
            # log(exp(lv)) == lv — use the log-variances directly.
            d2 = 0.5 * (jnp.sum(jnp.log(sm), axis=-1, keepdims=True)
                        - 0.5 * (sum_lv1 + jnp.sum(lv2, axis=-1, keepdims=True)))
            return d1 + d2                                     # (B, 1)

        d12 = bhatt(es, lvs, s2s)
        d13 = bhatt(et, lvt, s2t)

        cons = (d13 - d12) * sgn + margin
        loss_anchor = jnp.maximum(0.0, cons) * jnp.abs(sgn)
        loss_mask = (cons > 0).astype(jnp.float32)
        denom = jnp.sum(jnp.abs(sgn) * loss_mask)
        safe = jnp.where(denom > 0, denom, 1.0)
        triple = jnp.where(denom > 0, jnp.sum(loss_anchor) / safe, 0.0)

        misc_ref[0] = kl
        misc_ref[1] = triple

    # ---------------- every step: CE partial sum over this row tile ---------
    logit = logit_ref[...]                                     # (T, C) f32
    tgt = tgt_ref[...]                                         # (T, 1) i32
    row_max = jnp.max(logit, axis=-1, keepdims=True)
    lse = jnp.log(jnp.sum(jnp.exp(logit - row_max), axis=-1, keepdims=True)) + row_max
    # correct-class logit via iota compare (no one-hot input needed)
    cls_iota = jax.lax.broadcasted_iota(jnp.int32, logit.shape, 1)
    correct = jnp.sum(jnp.where(cls_iota == tgt, logit, 0.0), axis=-1, keepdims=True)
    per_row = lse - correct                                    # (T, 1)
    if needs_mask:
        # Rows past n_rows in the last (partial) tile hold unspecified data;
        # jnp.where zeroes their contribution (NaN in the unselected branch
        # does not propagate).
        row_ids = (jax.lax.broadcasted_iota(jnp.int32, (tile_rows, 1), 0)
                   + i * tile_rows)
        per_row = jnp.where(row_ids < n_rows, per_row, 0.0)
    ce_acc_ref[...] += jnp.sum(per_row, axis=0, keepdims=True)

    # ---------------- final step: combine and emit scalars ------------------
    @pl.when(i == pl.num_programs(0) - 1)
    def _finalize():
        ce = jnp.sum(ce_acc_ref[...]) * (1.0 / n_rows)
        kl = misc_ref[0]
        triple = misc_ref[1]
        out_ref[0] = ce
        out_ref[1] = kl * alpha
        out_ref[2] = triple * beta
        out_ref[3] = ce + alpha * kl + beta * triple


def prob_ordi_loss(logit, emb, log_var, target, *,
                   alpha_coeff=0.5, beta_coeff=0.5, margin=0.1,
                   max_tile_rows=1024, tile_vmem_budget=8 * 1024 * 1024):
    """Forward of ProbOrdiLoss ('cls' main loss, use_sto=True, Bhattacharyya)."""
    S, B, C = logit.shape
    _, D = emb.shape
    N = S * B

    # ---- CE operands: logits [N, C] + tiled int32 targets [N, 1] ----
    logit2d = logit.reshape(N, C).astype(jnp.float32)
    tgt2d = jnp.tile(target.astype(jnp.int32), S).reshape(N, 1)

    # Biggest row tile whose logits block fits the VMEM budget (double
    # buffering handled by keeping the budget conservative); multiple of 8.
    rows_fit = max(8, (int(tile_vmem_budget) // (C * 4)) // 8 * 8)
    tile_rows = int(min(max_tile_rows, rows_fit, _round_up(N, 8)))
    n_tiles = int(pl.cdiv(N, tile_rows))
    needs_mask = (n_tiles * tile_rows != N)

    # ---- triplet index selection (tiny integer glue, plain JAX) ----
    t = target.astype(jnp.int32)
    second = (jnp.arange(B, dtype=jnp.int32) + 1) % B
    tdis = jnp.abs(t[:, None] - t[None, :])
    tdis = jnp.abs(tdis - jnp.abs(t - t[second])[:, None])
    tdis = tdis + jnp.eye(B, dtype=tdis.dtype) * 1000
    tdis = jnp.where(tdis == 0, jnp.array(700, tdis.dtype), tdis)
    third = jnp.argmin(tdis, axis=1).astype(jnp.int32)
    anchor_sign = jnp.sign(jnp.abs(t - t[second])
                           - jnp.abs(t - t[third])).astype(jnp.float32)

    # Only mu / log_var go to the kernel as [B, D] slabs (stacked), plus a
    # tiny (B, 2) aux array = [anchor_sign, third-index-as-float].
    mulv = jnp.stack([emb.astype(jnp.float32), log_var.astype(jnp.float32)])  # (2,B,D)
    aux = jnp.stack([anchor_sign, third.astype(jnp.float32)], axis=1)         # (B,2)

    kernel = functools.partial(
        _loss_kernel, alpha=float(alpha_coeff), beta=float(beta_coeff),
        margin=float(margin), n_rows=N, tile_rows=tile_rows,
        needs_mask=needs_mask)

    out = pl.pallas_call(
        kernel,
        out_shape=jax.ShapeDtypeStruct((4,), jnp.float32),
        grid_spec=pltpu.PrefetchScalarGridSpec(
            num_scalar_prefetch=0,
            grid=(n_tiles,),
            in_specs=[
                pl.BlockSpec((tile_rows, C), lambda i: (i, 0)),   # logits tile
                pl.BlockSpec((tile_rows, 1), lambda i: (i, 0)),   # targets tile
                pl.BlockSpec((2, B, D), lambda i: (0, 0, 0)),     # resident mu/logvar
                pl.BlockSpec((B, 2), lambda i: (0, 0)),           # resident sign/third
            ],
            out_specs=pl.BlockSpec(memory_space=pltpu.MemorySpace.SMEM),
            scratch_shapes=[
                pltpu.VMEM((1, 1), jnp.float32),                  # CE accumulator
                pltpu.SMEM((2,), jnp.float32),                    # kl / triplet
            ],
        ),
        compiler_params=pltpu.CompilerParams(
            dimension_semantics=("arbitrary",),       # CE reduction is sequential
            vmem_limit_bytes=32 * 1024 * 1024),       # safe on v5e/v6e/v7x (<=64 MiB)
    )(logit2d, tgt2d, mulv, aux)
    return out[0], out[1], out[2], out[3]


def _reference(logit, emb, log_var, target, alpha, beta, margin):
    """Plain-JAX mirror of the PyTorch forward for sanity checking."""
    S, B, C = logit.shape
    lg = logit.reshape(-1, C).astype(jnp.float32)
    tgt = jnp.tile(target, S)
    lse = jax.scipy.special.logsumexp(lg, axis=-1)
    ce = jnp.mean(lse - lg[jnp.arange(lg.shape[0]), tgt])
    kl = jnp.mean(jnp.sum(emb ** 2 + jnp.exp(log_var) - log_var - 1.0, axis=1) * 0.5)
    var = jnp.exp(log_var)
    t = target.astype(jnp.int32)
    anchor = jnp.arange(B)
    second = (anchor + 1) % B
    tdis = jnp.abs(t[:, None] - t[None, :])
    tdis = jnp.abs(tdis - jnp.abs(t[anchor] - t[second])[:, None])
    tdis = tdis + jnp.eye(B, dtype=tdis.dtype) * 1000
    tdis = jnp.where(tdis == 0, jnp.array(700, tdis.dtype), tdis)
    third = jnp.argmin(tdis, axis=1)
    sign = jnp.sign(jnp.abs(t[anchor] - t[second])
                    - jnp.abs(t[anchor] - t[third])).astype(jnp.float32)

    def bd(u1, s1, u2, s2):
        sm = (s1 + s2) / 2.0
        d1 = jnp.sum((u1 - u2) ** 2 / sm, axis=1) / 8.0
        d2 = 0.5 * (jnp.sum(jnp.log(sm), axis=1)
                    - 0.5 * (jnp.sum(jnp.log(s1), axis=1) + jnp.sum(jnp.log(s2), axis=1)))
        return d1 + d2

    d12 = bd(emb[anchor], var[anchor], emb[second], var[second])
    d13 = bd(emb[anchor], var[anchor], emb[third], var[third])
    cons = (d13 - d12) * sign + margin
    la = jnp.maximum(0.0, cons) * jnp.abs(sign)
    mask = (cons > 0).astype(jnp.float32)
    denom = jnp.sum(jnp.abs(sign) * mask)
    triple = jnp.where(denom > 0, jnp.sum(la) / jnp.where(denom > 0, denom, 1.0), 0.0)
    return ce, kl * alpha, triple * beta, ce + alpha * kl + beta * triple


if __name__ == "__main__":
    # shapes implied by the forward: logit (sample_size, batch, class_dim),
    # emb / log_var (batch, dims), target (batch,)
    S, B, C, D = 2, 8, 8, 16
    alpha, beta, margin = 0.5, 0.5, 0.1

    key = jax.random.PRNGKey(0)
    k1, k2, k3, k4 = jax.random.split(key, 4)
    logit = jax.random.normal(k1, (S, B, C), dtype=jnp.float32)
    emb = jax.random.normal(k2, (B, D), dtype=jnp.float32)
    log_var = 0.1 * jax.random.normal(k3, (B, D), dtype=jnp.float32)
    target = jax.random.randint(k4, (B,), 0, C, dtype=jnp.int32)

    outs = jax.block_until_ready(
        prob_ordi_loss(logit, emb, log_var, target,
                       alpha_coeff=alpha, beta_coeff=beta, margin=margin))

    refs = _reference(logit, emb, log_var, target, alpha, beta, margin)
    for got, want in zip(outs, refs):
        assert jnp.allclose(got, want, rtol=1e-4, atol=1e-4), (got, want)

    print("KERNEL_OK")
</pallas_src>

<mosaic_0001>
module attributes {stable_mosaic.version = 11 : i64} {
  func.func @_loss_kernel(%arg0: i32, %arg1: memref<16x8xf32, #tpu.memory_space<vmem>>, %arg2: memref<16x1xi32, #tpu.memory_space<vmem>>, %arg3: memref<2x8x16xf32, #tpu.memory_space<vmem>>, %arg4: memref<8x2xf32, #tpu.memory_space<vmem>>, %arg5: memref<4xf32, #tpu.memory_space<smem>>, %arg6: memref<1x1xf32, #tpu.memory_space<vmem>>, %arg7: memref<2xf32, #tpu.memory_space<smem>>) attributes {dimension_semantics = [#tpu.dimension_semantics<arbitrary>], iteration_bounds = array<i64: 1>, scalar_prefetch = 0 : i64, scratch_operands = 2 : i64, tpu.core_type = #tpu.core_type<tc>, window_params = [{transform_indices = @transform_0, window_bounds = array<i64: 16, 8>}, {transform_indices = @transform_1, window_bounds = array<i64: 16, 1>}, {pipeline_mode = #tpu.pipeline_mode<synchronous>, transform_indices = @transform_2, window_bounds = array<i64: 2, 8, 16>}, {pipeline_mode = #tpu.pipeline_mode<synchronous>, transform_indices = @transform_3, window_bounds = array<i64: 8, 2>}, {transform_indices = @transform_4, window_bounds = array<i64: 4>}]} {
    %c0_i32 = arith.constant 0 : i32
    %0 = arith.cmpi eq, %arg0, %c0_i32 : i32
    %1 = arith.extui %0 : i1 to i32
    %c0_i32_0 = arith.constant 0 : i32
    %2 = arith.cmpi ne, %1, %c0_i32_0 : i32
    scf.if %2 {
      %cst_14 = arith.constant 0.000000e+00 : f32
      %30 = vector.broadcast %cst_14 : f32 to vector<1x1xf32>
      %c0_15 = arith.constant 0 : index
      %c0_16 = arith.constant 0 : index
      %31 = vector.load %arg6[%c0_15, %c0_16] : memref<1x1xf32, #tpu.memory_space<vmem>>, vector<1x1xf32>
      tpu.vector_store %arg6[%c0_15, %c0_16], %30 {strides = array<i32>} : memref<1x1xf32, #tpu.memory_space<vmem>>, vector<1x1xf32>,
      %c0_17 = arith.constant 0 : index
      %c0_18 = arith.constant 0 : index
      %c0_19 = arith.constant 0 : index
      %32 = vector.load %arg3[%c0_17, %c0_18, %c0_19] : memref<2x8x16xf32, #tpu.memory_space<vmem>>, vector<1x8x16xf32>
      %33 = vector.shape_cast %32 : vector<1x8x16xf32> to vector<8x16xf32>
      %c1 = arith.constant 1 : index
      %c0_20 = arith.constant 0 : index
      %c0_21 = arith.constant 0 : index
      %34 = vector.load %arg3[%c1, %c0_20, %c0_21] : memref<2x8x16xf32, #tpu.memory_space<vmem>>, vector<1x8x16xf32>
      %35 = vector.shape_cast %34 : vector<1x8x16xf32> to vector<8x16xf32>
      %c0_22 = arith.constant 0 : index
      %c0_23 = arith.constant 0 : index
      %36 = vector.load %arg4[%c0_22, %c0_23] : memref<8x2xf32, #tpu.memory_space<vmem>>, vector<8x2xf32>
      %37 = vector.extract_strided_slice %36 {offsets = [0, 0], sizes = [8, 1], strides = [1, 1]} : vector<8x2xf32> to vector<8x1xf32>
      %38 = vector.extract_strided_slice %36 {offsets = [0, 1], sizes = [8, 1], strides = [1, 1]} : vector<8x2xf32> to vector<8x1xf32>
      %39 = arith.fptosi %38 : vector<8x1xf32> to vector<8x1xi32>
      %40 = math.exp %35 : vector<8x16xf32>
      %41 = arith.mulf %33, %33 : vector<8x16xf32>
      %42 = arith.addf %41, %40 : vector<8x16xf32>
      %43 = arith.subf %42, %35 : vector<8x16xf32>
      %cst_24 = arith.constant 1.000000e+00 : f32
      %44 = vector.broadcast %cst_24 : f32 to vector<8x16xf32>
      %45 = arith.subf %43, %44 : vector<8x16xf32>
      %cst_25 = arith.constant dense<0.000000e+00> : vector<8xf32>
      %46 = vector.multi_reduction <add>, %45, %cst_25 [1] : vector<8x16xf32> to vector<8xf32>
      %47 = vector.shape_cast %46 : vector<8xf32> to vector<8x1xf32>
      %48 = vector.shape_cast %47 : vector<8x1xf32> to vector<1x8x1xf32>
      %cst_26 = arith.constant dense<0.000000e+00> : vector<1xf32>
      %49 = vector.multi_reduction <add>, %48, %cst_26 [1, 2] : vector<1x8x1xf32> to vector<1xf32>
      %50 = vector.shape_cast %49 : vector<1xf32> to vector<1x1x1xf32>
      %51 = vector.extract %50[0, 0, 0] : f32 from vector<1x1x1xf32>
      %cst_27 = arith.constant 8.000000e+00 : f32
      %52 = arith.divf %51, %cst_27 : f32
      %cst_28 = arith.constant 5.000000e-01 : f32
      %53 = arith.mulf %52, %cst_28 : f32
      %54 = tpu.iota {dimensions = array<i32: 0>} : vector<8x8xi32>
      %55 = tpu.iota {dimensions = array<i32: 1>} : vector<8x8xi32>
      %c7_i32 = arith.constant 7 : i32
      %56 = vector.broadcast %c7_i32 : i32 to vector<8x8xi32>
      %57 = arith.cmpi eq, %54, %56 : vector<8x8xi32>
      %c1_i32 = arith.constant 1 : i32
      %58 = vector.broadcast %c1_i32 : i32 to vector<8x8xi32>
      %59 = arith.addi %54, %58 : vector<8x8xi32>
      %c0_i32_29 = arith.constant 0 : i32
      %60 = vector.broadcast %c0_i32_29 : i32 to vector<8x8xi32>
      %61 = arith.select %57, %60, %59 : vector<8x8xi1>, vector<8x8xi32>
      %62 = arith.cmpi eq, %55, %61 : vector<8x8xi32>
      %63 = arith.extui %62 : vector<8x8xi1> to vector<8x8xi32>
      %64 = arith.sitofp %63 : vector<8x8xi32> to vector<8x8xf32>
      %65 = vector.broadcast %39 : vector<8x1xi32> to vector<8x8xi32>
      %66 = arith.cmpi eq, %55, %65 : vector<8x8xi32>
      %67 = arith.extui %66 : vector<8x8xi1> to vector<8x8xi32>
      %68 = arith.sitofp %67 : vector<8x8xi32> to vector<8x8xf32>
      %cst_30 = arith.constant dense<0.000000e+00> : vector<8x16xf32>
      %69 = tpu.matmul %64, %33, %cst_30 {dimension_numbers = #tpu.dot_dimension_numbers<[1], [0], [0], [1], [0, 0, 1, 1], [], []>} : vector<8x8xf32>, vector<8x16xf32>, vector<8x16xf32> -> vector<8x16xf32>
      %cst_31 = arith.constant dense<0.000000e+00> : vector<8x16xf32>
      %70 = tpu.matmul %64, %35, %cst_31 {dimension_numbers = #tpu.dot_dimension_numbers<[1], [0], [0], [1], [0, 0, 1, 1], [], []>} : vector<8x8xf32>, vector<8x16xf32>, vector<8x16xf32> -> vector<8x16xf32>
      %cst_32 = arith.constant dense<0.000000e+00> : vector<8x16xf32>
      %71 = tpu.matmul %64, %40, %cst_32 {dimension_numbers = #tpu.dot_dimension_numbers<[1], [0], [0], [1], [0, 0, 1, 1], [], []>} : vector<8x8xf32>, vector<8x16xf32>, vector<8x16xf32> -> vector<8x16xf32>
      %cst_33 = arith.constant dense<0.000000e+00> : vector<8x16xf32>
      %72 = tpu.matmul %68, %33, %cst_33 {dimension_numbers = #tpu.dot_dimension_numbers<[1], [0], [0], [1], [0, 0, 1, 1], [], []>} : vector<8x8xf32>, vector<8x16xf32>, vector<8x16xf32> -> vector<8x16xf32>
      %cst_34 = arith.constant dense<0.000000e+00> : vector<8x16xf32>
      %73 = tpu.matmul %68, %35, %cst_34 {dimension_numbers = #tpu.dot_dimension_numbers<[1], [0], [0], [1], [0, 0, 1, 1], [], []>} : vector<8x8xf32>, vector<8x16xf32>, vector<8x16xf32> -> vector<8x16xf32>
      %cst_35 = arith.constant dense<0.000000e+00> : vector<8x16xf32>
      %74 = tpu.matmul %68, %40, %cst_35 {dimension_numbers = #tpu.dot_dimension_numbers<[1], [0], [0], [1], [0, 0, 1, 1], [], []>} : vector<8x8xf32>, vector<8x16xf32>, vector<8x16xf32> -> vector<8x16xf32>
      %cst_36 = arith.constant dense<0.000000e+00> : vector<8xf32>
      %75 = vector.multi_reduction <add>, %35, %cst_36 [1] : vector<8x16xf32> to vector<8xf32>
      %76 = vector.shape_cast %75 : vector<8xf32> to vector<8x1xf32>
      %77 = arith.addf %40, %71 : vector<8x16xf32>
      %cst_37 = arith.constant 5.000000e-01 : f32
      %78 = vector.broadcast %cst_37 : f32 to vector<8x16xf32>
      %79 = arith.mulf %77, %78 : vector<8x16xf32>
      %80 = tpu.reciprocal %79 {approx = true} : vector<8x16xf32> -> vector<8x16xf32>
      %81 = arith.mulf %79, %80 : vector<8x16xf32>
      %cst_38 = arith.constant 2.000000e+00 : f32
      %82 = vector.broadcast %cst_38 : f32 to vector<8x16xf32>
      %83 = arith.subf %82, %81 : vector<8x16xf32>
      %84 = arith.mulf %80, %83 : vector<8x16xf32>
      %85 = arith.subf %33, %69 : vector<8x16xf32>
      %86 = arith.mulf %85, %85 : vector<8x16xf32>
      %87 = arith.mulf %86, %84 : vector<8x16xf32>
      %cst_39 = arith.constant dense<0.000000e+00> : vector<8xf32>
      %88 = vector.multi_reduction <add>, %87, %cst_39 [1] : vector<8x16xf32> to vector<8xf32>
      %89 = vector.shape_cast %88 : vector<8xf32> to vector<8x1xf32>
      %cst_40 = arith.constant 1.250000e-01 : f32
      %90 = vector.broadcast %cst_40 : f32 to vector<8x1xf32>
      %91 = arith.mulf %89, %90 : vector<8x1xf32>
      %92 = math.log %79 : vector<8x16xf32>
      %cst_41 = arith.constant dense<0.000000e+00> : vector<8xf32>
      %93 = vector.multi_reduction <add>, %92, %cst_41 [1] : vector<8x16xf32> to vector<8xf32>
      %94 = vector.shape_cast %93 : vector<8xf32> to vector<8x1xf32>
      %cst_42 = arith.constant dense<0.000000e+00> : vector<8xf32>
      %95 = vector.multi_reduction <add>, %70, %cst_42 [1] : vector<8x16xf32> to vector<8xf32>
      %96 = vector.shape_cast %95 : vector<8xf32> to vector<8x1xf32>
      %97 = arith.addf %76, %96 : vector<8x1xf32>
      %cst_43 = arith.constant 5.000000e-01 : f32
      %98 = vector.broadcast %cst_43 : f32 to vector<8x1xf32>
      %99 = arith.mulf %98, %97 : vector<8x1xf32>
      %100 = arith.subf %94, %99 : vector<8x1xf32>
      %cst_44 = arith.constant 5.000000e-01 : f32
      %101 = vector.broadcast %cst_44 : f32 to vector<8x1xf32>
      %102 = arith.mulf %101, %100 : vector<8x1xf32>
      %103 = arith.addf %91, %102 : vector<8x1xf32>
      %104 = arith.addf %40, %74 : vector<8x16xf32>
      %cst_45 = arith.constant 5.000000e-01 : f32
      %105 = vector.broadcast %cst_45 : f32 to vector<8x16xf32>
      %106 = arith.mulf %104, %105 : vector<8x16xf32>
      %107 = tpu.reciprocal %106 {approx = true} : vector<8x16xf32> -> vector<8x16xf32>
      %108 = arith.mulf %106, %107 : vector<8x16xf32>
      %cst_46 = arith.constant 2.000000e+00 : f32
      %109 = vector.broadcast %cst_46 : f32 to vector<8x16xf32>
      %110 = arith.subf %109, %108 : vector<8x16xf32>
      %111 = arith.mulf %107, %110 : vector<8x16xf32>
      %112 = arith.subf %33, %72 : vector<8x16xf32>
      %113 = arith.mulf %112, %112 : vector<8x16xf32>
      %114 = arith.mulf %113, %111 : vector<8x16xf32>
      %cst_47 = arith.constant dense<0.000000e+00> : vector<8xf32>
      %115 = vector.multi_reduction <add>, %114, %cst_47 [1] : vector<8x16xf32> to vector<8xf32>
      %116 = vector.shape_cast %115 : vector<8xf32> to vector<8x1xf32>
      %cst_48 = arith.constant 1.250000e-01 : f32
      %117 = vector.broadcast %cst_48 : f32 to vector<8x1xf32>
      %118 = arith.mulf %116, %117 : vector<8x1xf32>
      %119 = math.log %106 : vector<8x16xf32>
      %cst_49 = arith.constant dense<0.000000e+00> : vector<8xf32>
      %120 = vector.multi_reduction <add>, %119, %cst_49 [1] : vector<8x16xf32> to vector<8xf32>
      %121 = vector.shape_cast %120 : vector<8xf32> to vector<8x1xf32>
      %cst_50 = arith.constant dense<0.000000e+00> : vector<8xf32>
      %122 = vector.multi_reduction <add>, %73, %cst_50 [1] : vector<8x16xf32> to vector<8xf32>
      %123 = vector.shape_cast %122 : vector<8xf32> to vector<8x1xf32>
      %124 = arith.addf %76, %123 : vector<8x1xf32>
      %cst_51 = arith.constant 5.000000e-01 : f32
      %125 = vector.broadcast %cst_51 : f32 to vector<8x1xf32>
      %126 = arith.mulf %125, %124 : vector<8x1xf32>
      %127 = arith.subf %121, %126 : vector<8x1xf32>
      %cst_52 = arith.constant 5.000000e-01 : f32
      %128 = vector.broadcast %cst_52 : f32 to vector<8x1xf32>
      %129 = arith.mulf %128, %127 : vector<8x1xf32>
      %130 = arith.addf %118, %129 : vector<8x1xf32>
      %131 = arith.subf %130, %103 : vector<8x1xf32>
      %132 = arith.mulf %131, %37 : vector<8x1xf32>
      %cst_53 = arith.constant 1.000000e-01 : f32
      %133 = vector.broadcast %cst_53 : f32 to vector<8x1xf32>
      %134 = arith.addf %132, %133 : vector<8x1xf32>
      %cst_54 = arith.constant 0.000000e+00 : f32
      %135 = vector.broadcast %cst_54 : f32 to vector<8x1xf32>
      %136 = arith.maximumf %135, %134 : vector<8x1xf32>
      %137 = math.absf %37 : vector<8x1xf32>
      %138 = arith.mulf %136, %137 : vector<8x1xf32>
      %cst_55 = arith.constant 0.000000e+00 : f32
      %139 = vector.broadcast %cst_55 : f32 to vector<8x1xf32>
      %140 = arith.cmpf ogt, %134, %139 : vector<8x1xf32>
      %141 = arith.extui %140 : vector<8x1xi1> to vector<8x1xi32>
      %142 = arith.sitofp %141 : vector<8x1xi32> to vector<8x1xf32>
      %143 = math.absf %37 : vector<8x1xf32>
      %144 = arith.mulf %143, %142 : vector<8x1xf32>
      %145 = vector.shape_cast %144 : vector<8x1xf32> to vector<1x8x1xf32>
      %cst_56 = arith.constant dense<0.000000e+00> : vector<1xf32>
      %146 = vector.multi_reduction <add>, %145, %cst_56 [1, 2] : vector<1x8x1xf32> to vector<1xf32>
      %147 = vector.shape_cast %146 : vector<1xf32> to vector<1x1x1xf32>
      %148 = vector.extract %147[0, 0, 0] : f32 from vector<1x1x1xf32>
      %cst_57 = arith.constant 0.000000e+00 : f32
      %149 = arith.cmpf ogt, %148, %cst_57 : f32
      %cst_58 = arith.constant 1.000000e+00 : f32
      %150 = arith.select %149, %148, %cst_58 : f32
      %cst_59 = arith.constant 0.000000e+00 : f32
      %151 = arith.cmpf ogt, %148, %cst_59 : f32
      %152 = vector.shape_cast %138 : vector<8x1xf32> to vector<1x8x1xf32>
      %cst_60 = arith.constant dense<0.000000e+00> : vector<1xf32>
      %153 = vector.multi_reduction <add>, %152, %cst_60 [1, 2] : vector<1x8x1xf32> to vector<1xf32>
      %154 = vector.shape_cast %153 : vector<1xf32> to vector<1x1x1xf32>
      %155 = vector.extract %154[0, 0, 0] : f32 from vector<1x1x1xf32>
      %156 = arith.divf %155, %150 : f32
      %cst_61 = arith.constant 0.000000e+00 : f32
      %157 = arith.select %151, %156, %cst_61 : f32
      %c0_62 = arith.constant 0 : index
      %158 = memref.load %arg7[%c0_62] : memref<2xf32, #tpu.memory_space<smem>>
      memref.store %53, %arg7[%c0_62] : memref<2xf32, #tpu.memory_space<smem>>
      %c1_63 = arith.constant 1 : index
      %159 = memref.load %arg7[%c1_63] : memref<2xf32, #tpu.memory_space<smem>>
      memref.store %157, %arg7[%c1_63] : memref<2xf32, #tpu.memory_space<smem>>
    } else {
    }
    %c0 = arith.constant 0 : index
    %c0_1 = arith.constant 0 : index
    %3 = vector.load %arg1[%c0, %c0_1] : memref<16x8xf32, #tpu.memory_space<vmem>>, vector<16x8xf32>
    %c0_2 = arith.constant 0 : index
    %c0_3 = arith.constant 0 : index
    %4 = vector.load %arg2[%c0_2, %c0_3] : memref<16x1xi32, #tpu.memory_space<vmem>>, vector<16x1xi32>
    %cst = arith.constant dense<0xFF800000> : vector<16xf32>
    %5 = vector.multi_reduction <maximumf>, %3, %cst [1] : vector<16x8xf32> to vector<16xf32>
    %6 = vector.shape_cast %5 : vector<16xf32> to vector<16x1xf32>
    %7 = vector.broadcast %6 : vector<16x1xf32> to vector<16x8xf32>
    %8 = arith.subf %3, %7 : vector<16x8xf32>
    %9 = math.exp %8 : vector<16x8xf32>
    %cst_4 = arith.constant dense<0.000000e+00> : vector<16xf32>
    %10 = vector.multi_reduction <add>, %9, %cst_4 [1] : vector<16x8xf32> to vector<16xf32>
    %11 = vector.shape_cast %10 : vector<16xf32> to vector<16x1xf32>
    %12 = math.log %11 : vector<16x1xf32>
    %13 = arith.addf %12, %6 : vector<16x1xf32>
    %14 = tpu.iota {dimensions = array<i32: 1>} : vector<16x8xi32>
    %15 = vector.broadcast %4 : vector<16x1xi32> to vector<16x8xi32>
    %16 = arith.cmpi eq, %14, %15 : vector<16x8xi32>
    %cst_5 = arith.constant 0.000000e+00 : f32
    %17 = vector.broadcast %cst_5 : f32 to vector<16x8xf32>
    %18 = arith.select %16, %3, %17 : vector<16x8xi1>, vector<16x8xf32>
    %cst_6 = arith.constant dense<0.000000e+00> : vector<16xf32>
    %19 = vector.multi_reduction <add>, %18, %cst_6 [1] : vector<16x8xf32> to vector<16xf32>
    %20 = vector.shape_cast %19 : vector<16xf32> to vector<16x1xf32>
    %21 = arith.subf %13, %20 : vector<16x1xf32>
    %c0_7 = arith.constant 0 : index
    %c0_8 = arith.constant 0 : index
    %22 = vector.load %arg6[%c0_7, %c0_8] : memref<1x1xf32, #tpu.memory_space<vmem>>, vector<1x1xf32>
    %cst_9 = arith.constant dense<0.000000e+00> : vector<1xf32>
    %23 = vector.multi_reduction <add>, %21, %cst_9 [0] : vector<16x1xf32> to vector<1xf32>
    %24 = vector.shape_cast %23 : vector<1xf32> to vector<1x1xf32>
    %25 = arith.addf %22, %24 : vector<1x1xf32>
    %c0_10 = arith.constant 0 : index
    %c0_11 = arith.constant 0 : index
    %26 = vector.load %arg6[%c0_10, %c0_11] : memref<1x1xf32, #tpu.memory_space<vmem>>, vector<1x1xf32>
    tpu.vector_store %arg6[%c0_10, %c0_11], %25 {strides = array<i32>} : memref<1x1xf32, #tpu.memory_space<vmem>>, vector<1x1xf32>,
    %c0_i32_12 = arith.constant 0 : i32
    %27 = arith.cmpi eq, %arg0, %c0_i32_12 : i32
    %28 = arith.extui %27 : i1 to i32
    %c0_i32_13 = arith.constant 0 : i32
    %29 = arith.cmpi ne, %28, %c0_i32_13 : i32
    scf.if %29 {
      %c0_14 = arith.constant 0 : index
      %c0_15 = arith.constant 0 : index
      %30 = vector.load %arg6[%c0_14, %c0_15] : memref<1x1xf32, #tpu.memory_space<vmem>>, vector<1x1xf32>
      %31 = vector.shape_cast %30 : vector<1x1xf32> to vector<1x1x1xf32>
      %cst_16 = arith.constant dense<0.000000e+00> : vector<1xf32>
      %32 = vector.multi_reduction <add>, %31, %cst_16 [1, 2] : vector<1x1x1xf32> to vector<1xf32>
      %33 = vector.shape_cast %32 : vector<1xf32> to vector<1x1x1xf32>
      %34 = vector.extract %33[0, 0, 0] : f32 from vector<1x1x1xf32>
      %cst_17 = arith.constant 6.250000e-02 : f32
      %35 = arith.mulf %34, %cst_17 : f32
      %c0_18 = arith.constant 0 : index
      %36 = memref.load %arg7[%c0_18] : memref<2xf32, #tpu.memory_space<smem>>
      %c1 = arith.constant 1 : index
      %37 = memref.load %arg7[%c1] : memref<2xf32, #tpu.memory_space<smem>>
      %c0_19 = arith.constant 0 : index
      %38 = memref.load %arg5[%c0_19] : memref<4xf32, #tpu.memory_space<smem>>
      memref.store %35, %arg5[%c0_19] : memref<4xf32, #tpu.memory_space<smem>>
      %cst_20 = arith.constant 5.000000e-01 : f32
      %39 = arith.mulf %36, %cst_20 : f32
      %c1_21 = arith.constant 1 : index
      %40 = memref.load %arg5[%c1_21] : memref<4xf32, #tpu.memory_space<smem>>
      memref.store %39, %arg5[%c1_21] : memref<4xf32, #tpu.memory_space<smem>>
      %cst_22 = arith.constant 5.000000e-01 : f32
      %41 = arith.mulf %37, %cst_22 : f32
      %c2 = arith.constant 2 : index
      %42 = memref.load %arg5[%c2] : memref<4xf32, #tpu.memory_space<smem>>
      memref.store %41, %arg5[%c2] : memref<4xf32, #tpu.memory_space<smem>>
      %cst_23 = arith.constant 5.000000e-01 : f32
      %43 = arith.mulf %cst_23, %36 : f32
      %44 = arith.addf %35, %43 : f32
      %cst_24 = arith.constant 5.000000e-01 : f32
      %45 = arith.mulf %cst_24, %37 : f32
      %46 = arith.addf %44, %45 : f32
      %c3 = arith.constant 3 : index
      %47 = memref.load %arg5[%c3] : memref<4xf32, #tpu.memory_space<smem>>
      memref.store %46, %arg5[%c3] : memref<4xf32, #tpu.memory_space<smem>>
    } else {
    }
    return
  }
  func.func @transform_0(%arg0: i32) -> (i32, i32) {
    %c0_i32 = arith.constant 0 : i32
    %c0_i32_0 = arith.constant 0 : i32
    return %arg0, %c0_i32 : i32, i32
  }
  func.func @transform_1(%arg0: i32) -> (i32, i32) {
    %c0_i32 = arith.constant 0 : i32
    %c0_i32_0 = arith.constant 0 : i32
    return %arg0, %c0_i32 : i32, i32
  }
  func.func @transform_2(%arg0: i32) -> (i32, i32, i32) {
    %c0_i32 = arith.constant 0 : i32
    %c0_i32_0 = arith.constant 0 : i32
    %c0_i32_1 = arith.constant 0 : i32
    %c0_i32_2 = arith.constant 0 : i32
    return %c0_i32, %c0_i32_0, %c0_i32_1 : i32, i32, i32
  }
  func.func @transform_3(%arg0: i32) -> (i32, i32) {
    %c0_i32 = arith.constant 0 : i32
    %c0_i32_0 = arith.constant 0 : i32
    %c0_i32_1 = arith.constant 0 : i32
    return %c0_i32, %c0_i32_0 : i32, i32
  }
  func.func @transform_4(%arg0: i32) -> i32 {
    %c0_i32 = arith.constant 0 : i32
    %c0_i32_0 = arith.constant 0 : i32
    return %c0_i32 : i32
  }
}

</mosaic_0001>

<bundles_post_ra>
// kernel: tpu_custom_call.1
= control target key start
LH: loop header
LB: loop body
LE: loop exit
PB: predicated region body
PF: predicated region fallthrough
CT: control target
= control target key end

     0   :  { %vm22_vm0 = vcmask 0   ;;  %v60_v2 = vlaneseq  ;;  %v482_v4 = vmov 1   ;;  %v483_v8 = vmov 0.0   ;;  %s629_s0 = inlined_call_operand.vmem [shape: f32[16,8], index: 0, kind: input, shape index: {}]   ;;  %s630_s1 = inlined_call_operand.vmem [shape: s32[16,1], index: 1, kind: input, shape index: {}]   ;;  %s631_s2 = inlined_call_operand.vmem [shape: f32[2,8,16], index: 2, kind: input, shape index: {}]   ;;  %s632_s3 = inlined_call_operand.vmem [shape: f32[8,2], index: 3, kind: input, shape index: {}]   ;;  %s633_s4 = inlined_call_operand.hbm [shape: f32[4], index: 4, kind: output, shape index: {}]  }
   0x1   :  { %v515_v0 = vld [vmem:[%s632_s3] sm:$0xff]  ;;  %v520_v1 = vld [vmem:[%s631_s2 + $0x8] sm:$0xff]  ;;  %442 = vset.pattern.permute.xlu0 %v482_v4  ;;  %23 = vst.msk [vmem:[#allocation2] sm:$0x1] %vm22_vm0, %v483_v8 }
   0x2   :  { %v525_v3 = vld [vmem:[%s631_s2] sm:$0xff]  ;;  %vm420_vm1 = vcmp.lt.s32.totalorder %v515_v0, 0  ;;  %v421_v5 = vceil.f32 %v515_v0  ;;  %v422_v6 = vfloor.f32 %v515_v0  ;;  %v29_v7 = vmul.f32 1.442695, %v520_v1  ;;  %115 = vmatpush.msra.mxu1 %v520_v1 }
   0x3   :  { %95 = vmatpush.msra.mxu0 %v525_v3  ;;  %v61_v9 = vshrl.u32 %v60_v2, 7  ;;  %158 = vmatpush.msra.mxu3 %v525_v3 }
   0x4   :  { %9 = vsyncpa [#allocation5], 0  ;;  %v423_v10 = vsel %vm420_vm1, %v421_v5, %v422_v6  ;;  %446 = vpow2.f32 %v29_v7  ;;  %v536_v11 = vand.u32 127, %v60_v2  ;;  %vm76_vm4 = vcmask 64512   ;;  %v565_v58 = vld [vmem:[%s629_s0 + $0x8] sm:$0xff]  ;;  %v573_v61 = vld [vmem:[%s629_s0] sm:$0xff] }
   0x5   :  { %178 = vmatpush.msrb.mxu0 %v520_v1  ;;  %v424_v12 = vcvt.f32.s32 %v423_v10  ;;  %vm64_vm2 = vcmp.eq.s32.totalorder %v61_v9, 7  ;;  %v65_v13 = vadd.s32 1, %v61_v9  ;;  %vm35_vm6 = vcmask 130048   ;;  %s398_s14 = sshll.u32 %s633_s4, 4  ;;  %s486_s17 = smov [#allocation4]   ;;  %s399_s14 = int_to_ptr.hbm [resolvable:$true] %s398_s14 }
   0x6   :  { %v203_v19 = vsel %vm35_vm6, %v520_v1, 0.0  ;;  %v31_v33 = vmul.f32 %v525_v3, %v525_v3  ;;  %v320_v59 = vsel %vm76_vm4, %v565_v58, -inf  ;;  %v317_v62 = vsel %vm76_vm4, %v573_v61, -inf }
   0x7   :  { %71 = vperm.xlu0 %442, %v424_v12   ;;  %v66_v14 = vsel %vm64_vm2, 0, %v65_v13  ;;  %v484_v6 = vmov 0   ;;  %vm39_vm7 = vcmask 7168  }
   0x8   :  { %vm67_vm3 = vcmp.eq.s32.totalorder %v536_v11, %v66_v14  ;;  %443 = vset.pattern.permute.xlu2 %v484_v6  ;;  %444 = vset.pattern.permute.xlu1 %v484_v6 }
   0x9   :  { %v410_v15 = vsel %vm67_vm3, 1.0, %v483_v8 }
   0xa   :  { %v447_v16 = vpop.eup %446  ;;  %412 = vmatmul.msk.f32.vlgmr.msra.gmra.mxu0 %vm76_vm4, %v410_v15  ;;  %413 = vmatmul.msk.f32.vlgmr.msra.gmra.mxu1 %vm76_vm4, %v410_v15 }
   0xb   :  { %135 = vmatpush.msra.mxu2 %v447_v16  ;;  %198 = vmatpush.msrb.mxu1 %v447_v16  ;;  %v32_v40 = vadd.f32 %v447_v16, %v31_v33 }
   0xc   :  { %414 = vmatmul.msk.f32.vlgmr.msra.gmra.mxu2 %vm76_vm4, %v410_v15 }
   0xd   :  { %v33_v43 = vsub.f32 %v32_v40, %v520_v1 }
   0xf   :  { %v409_v46 = vadd.f32 -1.0, %v33_v43  ;;  %445 = vset.pattern.permute.xlu0 %v484_v6  ;;  %v315_v43 = vld [vmem:[%s630_s1 + $0x8] sm:$0xff] }
  0x11   :  { %v36_v53 = vsel %vm35_vm6, %v409_v46, 0.0 }
  0x31   :  { %204 = vadd.xlane.f32.xlu0 %v203_v19 }
  0x79   :  { %v72_v17 = vpop.permute.xlu0 %71 }
  0x7a   :  { %vm73_vm5 = vcmp.eq.s32.totalorder %v536_v11, %v72_v17 }
  0x7b   :  { %v411_v18 = vsel %vm73_vm5, 1.0, %v483_v8 }
  0x7c   :  { %415 = vmatmul.msk.f32.vlgmr.msra.gmra.mxu3 %vm76_vm4, %v411_v18  ;;  %416 = vmatmul.msk.f32.vlgmr.msrb.gmra.mxu0 %vm76_vm4, %v411_v18 }
  0x7d   :  { %417 = vmatmul.msk.f32.vlgmr.msrb.gmra.mxu1 %vm76_vm4, %v411_v18 }
  0x87   :  { %v117_v20 = vpop.f32.mrf.mxu1  ;;  %v97_v29 = vpop.f32.mrf.mxu0 }
  0x88   :  { %v224_v21 = vsel %vm35_vm6, %v117_v20, 0.0  ;;  %v212_v32 = vsub.f32 %v525_v3, %v97_v29 }
  0x89   :  { %225 = vadd.xlane.f32.xlu1 %v224_v21 }
  0x8a   :  { %v213_v35 = vmul.f32 %v212_v32, %v212_v32 }
  0x8f   :  { %v137_v22 = vpop.f32.mrf.mxu2 }
  0x90   :  { %v206_v23 = vadd.f32 %v447_v16, %v137_v22 }
  0x92   :  { %v207_v24 = vmul.f32 0.5, %v206_v23 }
  0x94   :  { %448 = vlog2.f32 %v207_v24 }
  0x95   :  { %450 = vrcp.f32 %v207_v24 }
  0x9a   :  { %v449_v25 = vpop.eup %448 }
  0x9b   :  { %v220_v26 = vmul.f32 0.6931472, %v449_v25  ;;  %v451_v28 = vpop.eup %450 }
  0x9c   :  { %v209_v30 = vmul.f32 %v451_v28, %v207_v24 }
  0x9d   :  { %v221_v27 = vsel %vm35_vm6, %v220_v26, 0.0 }
  0x9e   :  { %222 = vadd.xlane.f32.xlu2 %v221_v27  ;;  %v210_v31 = vsub.f32 2.0, %v209_v30  ;;  %v262_v30 = vand.u32 2147483647, %v515_v0 }
  0xa0   :  { %v211_v38 = vmul.f32 %v451_v28, %v210_v31 }
  0xa2   :  { %v214_v42 = vmul.f32 %v213_v35, %v211_v38 }
  0xa4   :  { %v215_v44 = vsel %vm35_vm6, %v214_v42, 0.0  ;;  %v205_v4 = vpop.xlane.xlu0 %204 }
  0xf9   :  { %v180_v34 = vpop.f32.mrf.mxu0 }
  0xfa   :  { %v200_v36 = vpop.f32.mrf.mxu1  ;;  %v250_v37 = vsel %vm35_vm6, %v180_v34, 0.0 }
  0xfb   :  { %v232_v39 = vadd.f32 %v447_v16, %v200_v36  ;;  %251 = vadd.xlane.f32.xlu1 %v250_v37 }
  0xfc   :  { %v226_v63 = vpop.xlane.xlu1 %225 }
  0xfd   :  { %v233_v41 = vmul.f32 0.5, %v232_v39  ;;  %v227_v5 = vadd.f32 %v226_v63, %v205_v4 }
  0xff   :  { %452 = vrcp.f32 %v233_v41  ;;  %v160_v45 = vpop.f32.mrf.mxu3  ;;  %v228_v10 = vmul.f32 0.5, %v227_v5 }
 0x100   :  { %454 = vlog2.f32 %v233_v41  ;;  %v238_v50 = vsub.f32 %v525_v3, %v160_v45 }
 0x102   :  { %v239_v56 = vmul.f32 %v238_v50, %v238_v50 }
 0x103   :  { %216 = vadd.xlane.f32.xlu1 %v215_v44  ;;  %v485_v44 = vmov 8.0  }
 0x105   :  { %v453_v47 = vpop.eup %452 }
 0x106   :  { %v455_v48 = vpop.eup %454  ;;  %v235_v49 = vmul.f32 %v453_v47, %v233_v41 }
 0x107   :  { %v246_v51 = vmul.f32 0.6931472, %v455_v48 }
 0x108   :  { %v236_v52 = vsub.f32 2.0, %v235_v49 }
 0x109   :  { %v247_v54 = vsel %vm35_vm6, %v246_v51, 0.0 }
 0x10a   :  { %248 = vadd.xlane.f32.xlu2 %v247_v54  ;;  %v237_v55 = vmul.f32 %v453_v47, %v236_v52 }
 0x10b   :  { %37 = vadd.xlane.f32.xlu1 %v36_v53 }
 0x10c   :  { %v240_v57 = vmul.f32 %v239_v56, %v237_v55 }
 0x10e   :  { %v241_v60 = vsel %vm35_vm6, %v240_v57, 0.0 }
 0x111   :  { %v223_v2 = vpop.xlane.xlu2 %222 }
 0x112   :  { %242 = vadd.xlane.f32.xlu2 %v241_v60  ;;  %v229_v15 = vsub.f32 %v223_v2, %v228_v10 }
 0x113   :  { %321 = vmax.xlane.f32.xlu1 %v320_v59 }
 0x114   :  { %v230_v19 = vmul.f32 0.5, %v229_v15 }
 0x11a   :  { %318 = vmax.xlane.f32.xlu2 %v317_v62 }
 0x16e   :  { %v252_v1 = vpop.xlane.xlu1 %251 }
 0x16f   :  { %v253_v7 = vadd.f32 %v252_v1, %v205_v4 }
 0x171   :  { %v254_v14 = vmul.f32 0.5, %v253_v7 }
 0x176   :  { %v217_v3 = vpop.xlane.xlu1 %216 }
 0x177   :  { %v218_v17 = vmul.f32 0.125, %v217_v3 }
 0x179   :  { %v231_v22 = vadd.f32 %v230_v19, %v218_v17 }
 0x17d   :  { %v249_v9 = vpop.xlane.xlu2 %248 }
 0x17e   :  { %v38_v12 = vpop.xlane.xlu1 %37  ;;  %v255_v16 = vsub.f32 %v249_v9, %v254_v14 }
 0x17f   :  { %v40_v13 = vsel %vm39_vm7, %v38_v12, 0.0 }
 0x180   :  { %41 = vadd.xlane.f32.xlu2 %v40_v13  ;;  %v256_v20 = vmul.f32 0.5, %v255_v16 }
 0x185   :  { %v243_v18 = vpop.xlane.xlu2 %242 }
 0x186   :  { %v244_v21 = vmul.f32 0.125, %v243_v18  ;;  %v578_v25 = vpop.xlane.xlu1 %321 }
 0x187   :  { %v324_v31 = vsub.f32 %v565_v58, %v578_v25 }
 0x188   :  { %v257_v23 = vadd.f32 %v256_v20, %v244_v21 }
 0x189   :  { %v327_v36 = vmul.f32 1.442695, %v324_v31 }
 0x18a   :  { %v258_v24 = vsub.f32 %v257_v23, %v231_v22 }
 0x18c   :  { %v259_v26 = vmul.f32 %v258_v24, %v515_v0  ;;  %v314_v0 = vld [vmem:[%s630_s1] sm:$0xff] }
 0x18d   :  { %v581_v27 = vpop.xlane.xlu2 %318 }
 0x18e   :  { %v323_v28 = vsub.f32 %v573_v61, %v581_v27  ;;  %v260_v29 = vadd.f32 0.1, %v259_v26 }
 0x190   :  { %v325_v32 = vmul.f32 1.442695, %v323_v28  ;;  %vm264_vm8 = vcmp.gt.f32.partialorder %v260_v29, 0.0  ;;  %v261_v33 = vmax.f32 %v260_v29, 0.0 }
 0x191   :  { %v418_v34 = vsel %vm264_vm8, 1.0, %v483_v8 }
 0x192   :  { %456 = vpow2.f32 %v325_v32  ;;  %v267_v35 = vmul.f32 %v418_v34, %v262_v30  ;;  %v263_v37 = vmul.f32 %v262_v30, %v261_v33 }
 0x193   :  { %458 = vpow2.f32 %v327_v36 }
 0x194   :  { %v268_v38 = vsel %vm39_vm7, %v267_v35, 0.0  ;;  %v280_v39 = vsel %vm39_vm7, %v263_v37, 0.0  ;;  %460 = vrcp.f32 %v485_v44 }
 0x195   :  { %269 = vadd.xlane.f32.xlu1 %v268_v38 }
 0x198   :  { %v457_v40 = vpop.eup %456  ;;  %344 = vperm.xlu2 %443, %v314_v0  }
 0x199   :  { %v329_v41 = vsel %vm76_vm4, %v457_v40, 0.0  ;;  %v459_v8 = vpop.eup %458 }
 0x19a   :  { %330 = vadd.xlane.f32.xlu0 %v329_v41  ;;  %v332_v42 = vsel %vm76_vm4, %v459_v8, 0.0  ;;  %v461_v45 = vpop.eup %460 }
 0x19b   :  { %v51_v46 = vmul.f32 8.0, %v461_v45  ;;  %vm55_vm9 = vweird.f32 %v461_v45 }
 0x19d   :  { %v52_v47 = vsub.f32 1.0, %v51_v46 }
 0x19f   :  { %v53_v51 = vmul.f32 %v461_v45, %v52_v47 }
 0x1a1   :  { %v54_v54 = vadd.f32 %v461_v45, %v53_v51 }
 0x1a2   :  { %333 = vadd.xlane.f32.xlu0 %v332_v42 }
 0x1a3   :  { %v56_v62 = vsel %vm55_vm9, %v461_v45, %v54_v54  ;;  %v361_v45 = vld [vmem:[#allocation2] sm:$0x1] }
 0x1ae   :  { %347 = vperm.xlu1 %444, %v315_v43  }
 0x1d8   :  { %281 = vadd.xlane.f32.xlu1 %v280_v39 }
 0x1f3   :  { %v42_v48 = vpop.xlane.xlu2 %41 }
 0x1f4   :  { %v43_v49 = vrot.slane %v42_v48, 4 }
 0x1f6   :  { %v44_v50 = vadd.f32 %v43_v49, %v42_v48 }
 0x1f8   :  { %v45_v52 = vrot.slane %v44_v50, 2 }
 0x1fa   :  { %v46_v53 = vadd.f32 %v45_v52, %v44_v50 }
 0x1fb   :  { %v345_v55 = vpop.permute.xlu2 %344 }
 0x1fc   :  { %vm349_vm10 = vcmp.eq.s32.totalorder %v536_v11, %v345_v55  ;;  %v47_v56 = vrot.slane %v46_v53, 1 }
 0x1fd   :  { %v351_v57 = vsel %vm349_vm10, %v573_v61, 0.0 }
 0x1fe   :  { %v353_v59 = vsel %vm76_vm4, %v351_v57, 0.0  ;;  %v48_v60 = vadd.f32 %v47_v56, %v46_v53 }
 0x1ff   :  { %354 = vadd.xlane.f32.xlu2 %v353_v59 }
 0x200   :  { %425 = vpush %v48_v60 }
 0x201   :  { %427 = vpush %v56_v62 }
 0x208   :  { %v270_v63 = vpop.xlane.xlu1 %269 }
 0x209   :  { %v271_v1 = vrot.slane %v270_v63, 4 }
 0x20b   :  { %v272_v2 = vadd.f32 %v271_v1, %v270_v63 }
 0x20d   :  { %v273_v3 = vrot.slane %v272_v2, 2  ;;  %v331_v29 = vpop.xlane.xlu0 %330 }
 0x20f   :  { %v274_v4 = vadd.f32 %v273_v3, %v272_v2 }
 0x211   :  { %v275_v5 = vrot.slane %v274_v4, 1 }
 0x213   :  { %v276_v6 = vadd.f32 %v275_v5, %v274_v4 }
 0x215   :  { %429 = vpush %v276_v6  ;;  %v334_v30 = vpop.xlane.xlu0 %333 }
 0x220   :  { %v348_v7 = vpop.permute.xlu1 %347 }
 0x221   :  { %vm350_vm11 = vcmp.eq.s32.totalorder %v536_v11, %v348_v7 }
 0x222   :  { %v352_v61 = vsel %vm350_vm11, %v565_v58, 0.0 }
 0x223   :  { %v356_v9 = vsel %vm76_vm4, %v352_v61, 0.0 }
 0x224   :  { %357 = vadd.xlane.f32.xlu0 %v356_v9 }
 0x231   :  { %s426_s1 = spop %425 }
 0x232   :  { %s428_s26 = spop %427 }
 0x233   :  { %s58_s27 = smul.f32 %s428_s26, %s426_s1 }
 0x235   :  { %s605_s28 = smul.f32 0.5, %s58_s27 }
 0x237   :  { %s383_s29 = smul.f32 0.5, %s605_s28 }
 0x239   :  { %385 = sst [smem:[#allocation4 + $0x1]] %s383_s29 }
 0x246   :  { %s610_s30 = spop %429 }
 0x247   :  { %p278_p0 = scmp.gt.f32.partialorder %s610_s30, 0.0 }
 0x249   :  { %s279_s5 = scalar_select %p278_p0, %s610_s30, 1.0 }
 0x24b   :  { %v290_v11 = vstv %s279_s5  ;;  %v282_v58 = vpop.xlane.xlu1 %281 }
 0x24c   :  { %462 = vrcp.f32 %v290_v11  ;;  %v283_v10 = vrot.slane %v282_v58, 4  ;;  %v302_v20 = vand.u32 2147483648, %v290_v11  ;;  %v300_v22 = vand.u32 2147483647, %v290_v11 }
 0x24d   :  { %vm296_vm13 = vweird.f32 %v290_v11  ;;  %464 = vlog2.f32 %v331_v29 }
 0x24e   :  { %v284_v12 = vadd.f32 %v283_v10, %v282_v58  ;;  %v303_v24 = vor.u32 1.1754944e-38, %v302_v20  ;;  %vm301_vm15 = vcmp.eq.f32.partialorder %v300_v22, 8.507059e+37  ;;  %466 = vlog2.f32 %v334_v30 }
 0x250   :  { %v285_v13 = vrot.slane %v284_v12, 2 }
 0x252   :  { %v463_v14 = vpop.eup %462  ;;  %v286_v15 = vadd.f32 %v285_v13, %v284_v12 }
 0x253   :  { %v292_v16 = vmul.f32 %v463_v14, %v290_v11  ;;  %vm297_vm12 = vweird.f32 %v463_v14  ;;  %v465_v31 = vpop.eup %464 }
 0x254   :  { %v287_v17 = vrot.slane %v286_v15, 1  ;;  %vm298_vm14 = vmor %vm296_vm13, %vm297_vm12  ;;  %v467_v32 = vpop.eup %466  ;;  %v336_v33 = vmul.f32 0.6931472, %v465_v31 }
 0x255   :  { %v293_v18 = vsub.f32 1.0, %v292_v16  ;;  %v338_v34 = vmul.f32 0.6931472, %v467_v32 }
 0x256   :  { %v288_v19 = vadd.f32 %v287_v17, %v286_v15  ;;  %v339_v36 = vadd.f32 %v336_v33, %v581_v27 }
 0x257   :  { %v294_v21 = vmul.f32 %v463_v14, %v293_v18  ;;  %v340_v37 = vadd.f32 %v338_v34, %v578_v25 }
 0x258   :  { %431 = vpush %v288_v19 }
 0x259   :  { %v295_v23 = vadd.f32 %v463_v14, %v294_v21 }
 0x25b   :  { %v299_v26 = vsel %vm298_vm14, %v463_v14, %v295_v23 }
 0x25c   :  { %v304_v28 = vsel %vm301_vm15, %v303_v24, %v299_v26 }
 0x25d   :  { %433 = vpush %v304_v28 }
 0x272   :  { %v355_v35 = vpop.xlane.xlu2 %354 }
 0x273   :  { %v359_v39 = vsub.f32 %v339_v36, %v355_v35 }
 0x289   :  { %s432_s6 = spop %431 }
 0x28e   :  { %s434_s7 = spop %433 }
 0x28f   :  { %s306_s8 = smul.f32 %s434_s7, %s432_s6 }
 0x291   :  { %s635_s8 = smov (!%p278_p0, %s306_s8), 0.0 }
 0x292   :  { %s386_s9 = smul.f32 0.5, %s635_s8 }
 0x294   :  { %388 = sst [smem:[#allocation4 + $0x2]] %s386_s9 }
 0x297   :  { %v358_v38 = vpop.xlane.xlu0 %357 }
 0x298   :  { %v360_v0 = vsub.f32 %v340_v37, %v358_v38 }
 0x29a   :  { %v362_v40 = vadd.f32 %v360_v0, %v359_v39 }
 0x29c   :  { %v363_v41 = vrot.slane %v362_v40, 4 }
 0x29e   :  { %v364_v8 = vadd.f32 %v363_v41, %v362_v40 }
 0x2a0   :  { %v365_v42 = vrot.slane %v364_v8, 2 }
 0x2a2   :  { %v366_v43 = vadd.f32 %v365_v42, %v364_v8 }
 0x2a4   :  { %v367_v44 = vrot.slane %v366_v43, 1 }
 0x2a6   :  { %v368_v46 = vadd.f32 %v367_v44, %v366_v43 }
 0x2a8   :  { %v369_v47 = vadd.f32 %v368_v46, %v361_v45 }
 0x2aa   :  { %371 = vst.msk [vmem:[#allocation2] sm:$0x1] %vm22_vm0, %v369_v47 }
 0x2b1   :  { %v375_v48 = vld [vmem:[#allocation2] sm:$0x1] }
 0x2b2   :  { %435 = vpush %v375_v48 }
 0x2e3   :  { %s436_s10 = spop %435 }
 0x2e4   :  { %s378_s11 = smul.f32 0.0625, %s436_s10 }
 0x2e6   :  { %382 = sst [smem:[#allocation4]] %s378_s11 }
 0x2e7   :  { %s389_s15 = sadd.f32 %s383_s29, %s378_s11 }
 0x2e9   :  { %s390_s16 = sadd.f32 %s389_s15, %s386_s9 }
 0x2eb   :  { %392 = sst [smem:[#allocation4 + $0x3]] %s390_s16 }
 0x2ec   :  { %401 = dma.smem_to_hbm %s486_s17, 16, %s399_s14, [#allocation5]  }
 0x2ed   :  { %480 = dma.done.wait [#allocation5], 16  }
 0x2ee   :  { %481 = vsyncadd [#allocation5], 4294967280 }
 0x2ef   :  { %406 = sfence }
 0x2f0   :  { %407 = vsyncpa [#allocation5], 1 }

</bundles_post_ra>
